<compile_context>
chip_gen: v6e
topology: v6e:2x2x1
jax: 0.10.0
libtpu: 0.0.40
codegen_flags: <defaults>
</compile_context>

<pallas_src>
import functools
import math

import jax
import jax.numpy as jnp
from jax import lax
from jax.experimental import pallas as pl
from jax.experimental.pallas import tpu as pltpu


# Matmul operand precision: bf16 operands, f32 accumulation.
_MATMUL_DTYPE = jnp.bfloat16


@functools.lru_cache(maxsize=None)
def _vmem_limit_bytes():
    """Per-generation VMEM limit (~75% of physical, capped), 48 MiB fallback."""
    cap = 64 * 1024 * 1024  # conservative fallback == v7x physical VMEM
    try:
        info = pltpu.get_tpu_info()
        cap = int(getattr(info, "vmem_capacity_bytes", cap) or cap)
    except Exception:
        pass
    return min(int(cap * 3 // 4), 112 * 1024 * 1024)


def _round_up(x, m):
    return (x + m - 1) // m * m


def _pick_tile(dim, target, units):
    """Largest divisor of dim that is <= target and a multiple of one of `units`."""
    if dim <= target:
        return dim
    for u in units:
        t = (target // u) * u
        while t >= u:
            if dim % t == 0:
                return t
            t -= u
    return dim


def _choose_tiles(M, N, K, x_bs, w_bs, o_bs, r_bs, need_full_n, budget):
    """Pick (tm, tn, tk, split_k); prefer tk=K so activations stay resident per M-tile."""
    big = budget > (64 << 20)          # v5e/v6e (128 MiB physical) vs v7x (64 MiB)
    tm = _pick_tile(M, 512 if big else 256, (8,))
    tn = N if need_full_n else _pick_tile(N, 1024 if big else 512, (256, 128))
    tk = K
    split = False

    def fits(tm_, tn_, tk_, split_):
        b = 2 * (tm_ * tk_ * x_bs + tk_ * tn_ * w_bs + tm_ * tn_ * o_bs)
        if r_bs:
            b += 2 * tm_ * tn_ * r_bs
        if split_:
            b += tm_ * tn_ * 4
        b += 8 * tn_ * 4               # bias / LayerNorm row vectors (tiny)
        return b <= budget

    if not fits(tm, tn, tk, split):
        split = True                   # only split K when the full-K tile can't fit
        tk = _pick_tile(K, 1024, (256, 128))
        while not fits(tm, tn, tk, split) and tk % 256 == 0 and K % (tk // 2) == 0:
            tk //= 2
    if not need_full_n:
        while not fits(tm, tn, tk, split) and tn % 256 == 0 and N % (tn // 2) == 0:
            tn //= 2
    while not fits(tm, tn, tk, split) and tm % 16 == 0 and M % (tm // 2) == 0:
        tm //= 2
    return tm, tn, tk, split


# ----------------------------------------------------------------------------
# elementwise helpers (run inside kernels, always in f32)
# ----------------------------------------------------------------------------
def _gelu(x):
    # tanh-form gelu (EUP tanh); |err| vs erf form ~1e-3 relative.
    return 0.5 * x * (1.0 + jnp.tanh(0.7978845608028654 * (x + 0.044715 * x * x * x)))


def _ln_math(x, g, b, eps):
    mean = jnp.mean(x, axis=-1, keepdims=True)
    var = jnp.mean(jnp.square(x - mean), axis=-1, keepdims=True)
    return (x - mean) * lax.rsqrt(var + eps) * g + b


# ----------------------------------------------------------------------------
# Pallas kernels
# ----------------------------------------------------------------------------
def _dense_epilogue(y, rest, fuse, activation, eps):
    if fuse == "res_ln":
        r_ref, g_ref, bt_ref, o_ref = rest
    elif fuse == "ln":
        g_ref, bt_ref, o_ref = rest
    else:
        (o_ref,) = rest
    if activation == "gelu":
        y = _gelu(y)
    if fuse == "res_ln":
        y = _ln_math(y + r_ref[...].astype(jnp.float32),
                     g_ref[...].astype(jnp.float32),
                     bt_ref[...].astype(jnp.float32), eps)
    elif fuse == "ln":
        y = _ln_math(y, g_ref[...].astype(jnp.float32),
                     bt_ref[...].astype(jnp.float32), eps)
    o_ref[...] = y.astype(o_ref.dtype)


def _dense_kernel(x_ref, w_ref, b_ref, *rest, activation, eps, fuse):
    # Full-K tile: single MXU pass per (i, j) grid point, fused epilogue, no scratch.
    w = w_ref[...]
    if w.dtype != _MATMUL_DTYPE:
        w = w.astype(_MATMUL_DTYPE)
    y = jnp.dot(x_ref[...].astype(_MATMUL_DTYPE), w, preferred_element_type=jnp.float32)
    y = y + b_ref[...].astype(jnp.float32)
    _dense_epilogue(y, rest, fuse, activation, eps)


def _dense_split_kernel(x_ref, w_ref, b_ref, *rest, activation, eps, fuse):
    # Split-K fallback: f32 VMEM accumulator with pl.when init/finalize.
    acc_ref = rest[-1]
    rest = rest[:-1]

    @pl.when(pl.program_id(2) == 0)
    def _init():
        acc_ref[...] = jnp.zeros_like(acc_ref)

    w = w_ref[...]
    if w.dtype != _MATMUL_DTYPE:
        w = w.astype(_MATMUL_DTYPE)
    acc_ref[...] += jnp.dot(x_ref[...].astype(_MATMUL_DTYPE), w,
                            preferred_element_type=jnp.float32)

    @pl.when(pl.program_id(2) == pl.num_programs(2) - 1)
    def _finalize():
        y = acc_ref[...] + b_ref[...].astype(jnp.float32)
        _dense_epilogue(y, rest, fuse, activation, eps)


def _emb_add_ln_kernel(w_ref, t_ref, p_ref, g_ref, b_ref, o_ref, *, eps):
    # Fused word + type + position embedding sum and LayerNorm (one HBM round trip).
    x = (w_ref[...].astype(jnp.float32) + t_ref[...].astype(jnp.float32)
         + p_ref[...].astype(jnp.float32))
    o_ref[...] = _ln_math(x, g_ref[...].astype(jnp.float32),
                          b_ref[...].astype(jnp.float32), eps).astype(o_ref.dtype)


def _attention_kernel(qkv_ref, m_ref, o_ref, *, heads_per_group, scale):
    # qkv_ref: (S, 3*gw) group-packed [q_g | k_g | v_g]; m_ref: (1, S); o_ref: (S, gw)
    S, W3 = qkv_ref.shape
    gw = W3 // 3
    d = gw // heads_per_group
    mask = m_ref[...].astype(jnp.float32)
    parts = []
    for h in range(heads_per_group):   # small static unroll (heads within one group)
        # TODO(synk): per-head slices are d-lane wide (64 at BERT-base); fully lane-
        #             aligned slices would need per-head padding to 128.
        q = (qkv_ref[:, h * d:(h + 1) * d].astype(jnp.float32) * scale).astype(_MATMUL_DTYPE)
        k = qkv_ref[:, gw + h * d:gw + (h + 1) * d].astype(_MATMUL_DTYPE)
        v = qkv_ref[:, 2 * gw + h * d:2 * gw + (h + 1) * d].astype(_MATMUL_DTYPE)
        s = lax.dot_general(q, k, (((1,), (1,)), ((), ())),
                            preferred_element_type=jnp.float32)
        s = s + mask
        s = s - jnp.max(s, axis=-1, keepdims=True)
        p = jnp.exp(s)
        denom = jnp.sum(p, axis=-1, keepdims=True)
        ctx = jnp.dot(p.astype(_MATMUL_DTYPE), v, preferred_element_type=jnp.float32)
        parts.append(ctx * pl.reciprocal(denom, approx=True))   # fold 1/sum into (S,d)
    ctx_all = parts[0] if len(parts) == 1 else jnp.concatenate(parts, axis=-1)
    o_ref[...] = ctx_all.astype(o_ref.dtype)   # lane-dense (S, gw) block store


# ----------------------------------------------------------------------------
# pallas_call wrappers
# ----------------------------------------------------------------------------
def dense(x, w, b, activation=None, residual=None, ln=None, ln_eps=1e-12):
    """y = act(x @ w + b); optional fused (residual add +) LayerNorm epilogue."""
    M, K = x.shape
    Kw, N = w.shape
    assert Kw == K

    budget = int(_vmem_limit_bytes() * 0.7)
    r_bs = residual.dtype.itemsize if residual is not None else 0
    tm, tn, tk, split_k = _choose_tiles(
        M, N, K, x.dtype.itemsize, w.dtype.itemsize, x.dtype.itemsize, r_bs,
        need_full_n=(ln is not None), budget=budget)

    fuse = "none"
    if residual is not None:
        assert ln is not None, "residual fusion requires a LayerNorm epilogue"
        fuse = "res_ln"
    elif ln is not None:
        fuse = "ln"

    if split_k:
        grid = (M // tm, N // tn, K // tk)
        in_specs = [pl.BlockSpec((tm, tk), lambda i, j, k: (i, k)),
                    pl.BlockSpec((tk, tn), lambda i, j, k: (k, j)),
                    pl.BlockSpec((1, tn), lambda i, j, k: (0, j))]
        out_spec = pl.BlockSpec((tm, tn), lambda i, j, k: (i, j))
        res_spec = pl.BlockSpec((tm, tn), lambda i, j, k: (i, j))
        vec_spec = pl.BlockSpec((1, tn), lambda i, j, k: (0, j))
        scratch = [pltpu.VMEM((tm, tn), jnp.float32)]
        semantics = ("parallel", "parallel", "arbitrary")
        kernel_fn = functools.partial(_dense_split_kernel, activation=activation,
                                      eps=ln_eps, fuse=fuse)
    else:
        # tk == K: x block depends only on i, so activations are fetched once per
        # M-tile while the (weight, bias) blocks stream across the N sweep.
        grid = (M // tm, N // tn)
        in_specs = [pl.BlockSpec((tm, K), lambda i, j: (i, 0)),
                    pl.BlockSpec((K, tn), lambda i, j: (0, j)),
                    pl.BlockSpec((1, tn), lambda i, j: (0, j))]
        out_spec = pl.BlockSpec((tm, tn), lambda i, j: (i, j))
        res_spec = pl.BlockSpec((tm, tn), lambda i, j: (i, j))
        vec_spec = pl.BlockSpec((1, tn), lambda i, j: (0, j))
        scratch = []
        semantics = ("parallel", "parallel")
        kernel_fn = functools.partial(_dense_kernel, activation=activation,
                                      eps=ln_eps, fuse=fuse)

    inputs = [x, w, b.reshape(1, N)]
    if fuse == "res_ln":
        in_specs.append(res_spec)
        inputs.append(residual)
    if ln is not None:
        g, bt = ln
        in_specs.extend([vec_spec, vec_spec])
        inputs.extend([g.reshape(1, N), bt.reshape(1, N)])

    return pl.pallas_call(
        kernel_fn,
        out_shape=jax.ShapeDtypeStruct((M, N), x.dtype),
        grid_spec=pltpu.PrefetchScalarGridSpec(
            num_scalar_prefetch=0, grid=grid,
            in_specs=in_specs, out_specs=out_spec, scratch_shapes=scratch),
        compiler_params=pltpu.CompilerParams(
            dimension_semantics=semantics,
            vmem_limit_bytes=_vmem_limit_bytes()),
    )(*inputs)


def embed_layer_norm(words, types, positions, gamma, beta, eps=1e-12):
    # words/types: (B, S, H); positions: (S, H) broadcast over batch via its BlockSpec.
    B, S, H = words.shape
    ts = _pick_tile(S, 256, (8,))
    out = pl.pallas_call(
        functools.partial(_emb_add_ln_kernel, eps=eps),
        out_shape=jax.ShapeDtypeStruct((B, S, H), words.dtype),
        grid_spec=pltpu.PrefetchScalarGridSpec(
            num_scalar_prefetch=0, grid=(B, S // ts),
            in_specs=[pl.BlockSpec((None, ts, H), lambda bi, si: (bi, si, 0)),
                      pl.BlockSpec((None, ts, H), lambda bi, si: (bi, si, 0)),
                      pl.BlockSpec((ts, H), lambda bi, si: (si, 0)),
                      pl.BlockSpec((1, H), lambda bi, si: (0, 0)),
                      pl.BlockSpec((1, H), lambda bi, si: (0, 0))],
            out_specs=pl.BlockSpec((None, ts, H), lambda bi, si: (bi, si, 0))),
        compiler_params=pltpu.CompilerParams(
            dimension_semantics=("parallel", "parallel"),
            vmem_limit_bytes=_vmem_limit_bytes()),
    )(words, types, positions, gamma.reshape(1, H), beta.reshape(1, H))
    return out.reshape(B * S, H)


def _heads_per_group(num_heads, head_dim):
    # Smallest group of consecutive heads whose width is a 128-lane multiple.
    for g in range(1, num_heads + 1):
        if num_heads % g == 0 and (g * head_dim) % 128 == 0:
            return g
    return num_heads


def attention_core(qkv3d, ext_mask, num_heads, scale, heads_per_group):
    # qkv3d: (B, S, 3H) group-packed [q_g|k_g|v_g] per head group; ext_mask: (B, 1, S).
    B, S, H3 = qkv3d.shape
    H = H3 // 3
    num_groups = num_heads // heads_per_group
    gw = H // num_groups
    # TODO(synk): for long sequences, tile the KV axis (flash-style online softmax)
    #             instead of holding the full (S, 3*gw) slab per grid step.
    return pl.pallas_call(
        functools.partial(_attention_kernel, heads_per_group=heads_per_group,
                          scale=scale),
        out_shape=jax.ShapeDtypeStruct((B, S, H), qkv3d.dtype),
        grid_spec=pltpu.PrefetchScalarGridSpec(
            num_scalar_prefetch=0, grid=(B, num_groups),
            in_specs=[pl.BlockSpec((None, S, 3 * gw), lambda bi, gi: (bi, 0, gi)),
                      pl.BlockSpec((None, 1, S), lambda bi, gi: (bi, 0, 0))],
            out_specs=pl.BlockSpec((None, S, gw), lambda bi, gi: (bi, 0, gi))),
        compiler_params=pltpu.CompilerParams(
            dimension_semantics=("parallel", "parallel"),
            vmem_limit_bytes=_vmem_limit_bytes()),
    )(qkv3d, ext_mask)


# ----------------------------------------------------------------------------
# BERT model (parameter setup / reshapes are plain-JAX glue)
# ----------------------------------------------------------------------------
def bert_layer(p, h2d, ext_mask, B, S, num_heads):
    H = h2d.shape[1]
    d = H // num_heads
    gph = _heads_per_group(num_heads, d)
    # Fused QKV projection: one (H, 3H) matmul; columns packed per head-group.
    qkv = dense(h2d, p["qkv_w"], p["qkv_b"])                       # (B*S, 3H)
    ctx = attention_core(qkv.reshape(B, S, 3 * H), ext_mask,
                         num_heads, 1.0 / math.sqrt(d), gph)       # (B, S, H)
    ctx2d = ctx.reshape(B * S, H)
    attn_out = dense(ctx2d, p["o_w"], p["o_b"],
                     residual=h2d, ln=(p["ln1_g"], p["ln1_b"]))
    inter = dense(attn_out, p["i_w"], p["i_b"], activation="gelu")
    out = dense(inter, p["out_w"], p["out_b"],
                residual=attn_out, ln=(p["ln2_g"], p["ln2_b"]))
    return out


def stage0_forward(params, cfg, input_ids, token_type_ids, attention_mask):
    B, S = input_ids.shape
    # TODO(synk): the embedding gathers stay in XLA; a scalar-prefetch row-gather kernel
    #             fused into the LayerNorm would save another HBM round trip.
    words = jnp.take(params["word_emb"], input_ids, axis=0)           # (B, S, H)
    types = jnp.take(params["type_emb"], token_type_ids, axis=0)      # (B, S, H)
    h = embed_layer_norm(words, types, params["pos_emb"][:S, :],
                         params["emb_ln_g"], params["emb_ln_b"])      # (B*S, H)
    ext_mask = (1.0 - attention_mask[:, None, :].astype(jnp.float32)) * -10000.0
    h = bert_layer(params["layer0"], h, ext_mask, B, S, cfg["heads"])
    return h, ext_mask                                                # (out1, out0)


def stage1_forward(params, cfg, hidden2d, ext_mask, B, S):
    h = bert_layer(params["layer1"], hidden2d, ext_mask, B, S, cfg["heads"])
    # MLM transform: dense + gelu + LayerNorm fused into one kernel.
    t = dense(h, params["mlm_dense_w"], params["mlm_dense_b"], activation="gelu",
              ln=(params["mlm_ln_g"], params["mlm_ln_b"]))
    # Tied decoder: pre-transposed bf16 (H, vocab_pad) weight, pad columns sliced off.
    logits = dense(t, params["decoder_w"], params["mlm_bias"])
    vocab = cfg["vocab"]
    return logits[:, :vocab].reshape(B, S, vocab)


def bert_partitioned_forward(params, cfg, input0, input1, input2):
    # input0=input_ids, input1=token_type_ids, input2=attention_mask
    B, S = input0.shape
    out1, out0 = stage0_forward(params, cfg, input0, input1, input2)
    out2 = stage1_forward(params, cfg, out1, out0, B, S)
    return out2


# ----------------------------------------------------------------------------
# deterministic parameter init (mirrors init_bert_weights: N(0, 0.02), LN = 1/0,
# biases = 0).  q/k/v weights are stored pre-fused as (H, 3H), group-packed columns.
# Weights stored bf16 (streamed from HBM); LN params / biases / embeddings stay f32.
# ----------------------------------------------------------------------------
def init_params(key, cfg):
    keys = iter(jax.random.split(key, 32))
    nrm = lambda shape: 0.02 * jax.random.normal(next(keys), shape, jnp.float32)
    wt = lambda shape: nrm(shape).astype(_MATMUL_DTYPE)
    H, I = cfg["hidden"], cfg["inter"]

    def init_layer():
        return dict(
            # qkv_w columns: for each head group g: [Wq_g | Wk_g | Wv_g].
            qkv_w=wt((H, 3 * H)), qkv_b=jnp.zeros((3 * H,), jnp.float32),
            o_w=wt((H, H)), o_b=jnp.zeros((H,), jnp.float32),
            ln1_g=jnp.ones((H,), jnp.float32), ln1_b=jnp.zeros((H,), jnp.float32),
            i_w=wt((H, I)), i_b=jnp.zeros((I,), jnp.float32),
            out_w=wt((I, H)), out_b=jnp.zeros((H,), jnp.float32),
            ln2_g=jnp.ones((H,), jnp.float32), ln2_b=jnp.zeros((H,), jnp.float32),
        )

    vocab = cfg["vocab"]
    vocab_pad = _round_up(vocab, 512)       # e.g. 30522 -> 30720 so the decoder tiles
    word_emb = nrm((vocab, H))              # f32 master copy for the embedding gather
    decoder_w = jnp.zeros((H, vocab_pad), _MATMUL_DTYPE)
    decoder_w = decoder_w.at[:, :vocab].set(word_emb.T.astype(_MATMUL_DTYPE))

    return dict(
        word_emb=word_emb,
        decoder_w=decoder_w,                # tied MLM decoder, matmul-native layout
        pos_emb=nrm((cfg["max_pos"], H)),
        type_emb=nrm((cfg["types"], H)),
        emb_ln_g=jnp.ones((H,), jnp.float32),
        emb_ln_b=jnp.zeros((H,), jnp.float32),
        layer0=init_layer(),
        layer1=init_layer(),
        mlm_dense_w=wt((H, H)),
        mlm_dense_b=jnp.zeros((H,), jnp.float32),
        mlm_ln_g=jnp.ones((H,), jnp.float32),
        mlm_ln_b=jnp.zeros((H,), jnp.float32),
        mlm_bias=jnp.zeros((vocab_pad,), jnp.float32),
    )


if __name__ == "__main__":
    B, S = 2, 8
    cfg = dict(vocab=128, hidden=32, heads=4, inter=64, max_pos=16, types=2)

    key = jax.random.PRNGKey(0)
    pkey, ikey, tkey = jax.random.split(key, 3)
    params = init_params(pkey, cfg)

    input_ids = jax.random.randint(ikey, (B, S), 0, cfg["vocab"], dtype=jnp.int32)
    token_type_ids = jax.random.randint(tkey, (B, S), 0, cfg["types"], dtype=jnp.int32)
    attention_mask = jnp.ones((B, S), dtype=jnp.float32)

    out = bert_partitioned_forward(params, cfg, input_ids, token_type_ids, attention_mask)
    out = jax.block_until_ready(out)
    assert out.shape == (B, S, cfg["vocab"]) and out.dtype == jnp.float32
    assert bool(jnp.all(jnp.isfinite(out)))
    print("KERNEL_OK")
</pallas_src>

<mosaic_0001>
module attributes {stable_mosaic.version = 11 : i64} {
  func.func @_emb_add_ln_kernel(%arg0: i32, %arg1: i32, %arg2: memref<1x8x32xf32, #tpu.memory_space<vmem>>, %arg3: memref<1x8x32xf32, #tpu.memory_space<vmem>>, %arg4: memref<8x32xf32, #tpu.memory_space<vmem>>, %arg5: memref<1x32xf32, #tpu.memory_space<vmem>>, %arg6: memref<1x32xf32, #tpu.memory_space<vmem>>, %arg7: memref<1x8x32xf32, #tpu.memory_space<vmem>>) attributes {dimension_semantics = [#tpu.dimension_semantics<parallel>, #tpu.dimension_semantics<parallel>], iteration_bounds = array<i64: 2, 1>, scalar_prefetch = 0 : i64, scratch_operands = 0 : i64, tpu.core_type = #tpu.core_type<tc>, window_params = [{transform_indices = @transform_0, window_bounds = array<i64: 1, 8, 32>}, {transform_indices = @transform_1, window_bounds = array<i64: 1, 8, 32>}, {transform_indices = @transform_2, window_bounds = array<i64: 8, 32>}, {pipeline_mode = #tpu.pipeline_mode<synchronous>, transform_indices = @transform_3, window_bounds = array<i64: 1, 32>}, {pipeline_mode = #tpu.pipeline_mode<synchronous>, transform_indices = @transform_4, window_bounds = array<i64: 1, 32>}, {transform_indices = @transform_5, window_bounds = array<i64: 1, 8, 32>}]} {
    %c0 = arith.constant 0 : index
    %c0_0 = arith.constant 0 : index
    %c0_1 = arith.constant 0 : index
    %0 = vector.load %arg2[%c0, %c0_0, %c0_1] : memref<1x8x32xf32, #tpu.memory_space<vmem>>, vector<1x8x32xf32>
    %1 = vector.shape_cast %0 : vector<1x8x32xf32> to vector<8x32xf32>
    %c0_2 = arith.constant 0 : index
    %c0_3 = arith.constant 0 : index
    %c0_4 = arith.constant 0 : index
    %2 = vector.load %arg3[%c0_2, %c0_3, %c0_4] : memref<1x8x32xf32, #tpu.memory_space<vmem>>, vector<1x8x32xf32>
    %3 = vector.shape_cast %2 : vector<1x8x32xf32> to vector<8x32xf32>
    %4 = arith.addf %1, %3 : vector<8x32xf32>
    %c0_5 = arith.constant 0 : index
    %c0_6 = arith.constant 0 : index
    %5 = vector.load %arg4[%c0_5, %c0_6] : memref<8x32xf32, #tpu.memory_space<vmem>>, vector<8x32xf32>
    %6 = arith.addf %4, %5 : vector<8x32xf32>
    %c0_7 = arith.constant 0 : index
    %c0_8 = arith.constant 0 : index
    %7 = vector.load %arg5[%c0_7, %c0_8] : memref<1x32xf32, #tpu.memory_space<vmem>>, vector<1x32xf32>
    %c0_9 = arith.constant 0 : index
    %c0_10 = arith.constant 0 : index
    %8 = vector.load %arg6[%c0_9, %c0_10] : memref<1x32xf32, #tpu.memory_space<vmem>>, vector<1x32xf32>
    %cst = arith.constant dense<0.000000e+00> : vector<8xf32>
    %9 = vector.multi_reduction <add>, %6, %cst [1] : vector<8x32xf32> to vector<8xf32>
    %10 = vector.shape_cast %9 : vector<8xf32> to vector<8x1xf32>
    %cst_11 = arith.constant 3.200000e+01 : f32
    %11 = vector.broadcast %cst_11 : f32 to vector<8x1xf32>
    %12 = arith.divf %10, %11 : vector<8x1xf32>
    %13 = vector.broadcast %12 : vector<8x1xf32> to vector<8x32xf32>
    %14 = arith.subf %6, %13 : vector<8x32xf32>
    %15 = arith.mulf %14, %14 : vector<8x32xf32>
    %cst_12 = arith.constant dense<0.000000e+00> : vector<8xf32>
    %16 = vector.multi_reduction <add>, %15, %cst_12 [1] : vector<8x32xf32> to vector<8xf32>
    %17 = vector.shape_cast %16 : vector<8xf32> to vector<8x1xf32>
    %cst_13 = arith.constant 3.200000e+01 : f32
    %18 = vector.broadcast %cst_13 : f32 to vector<8x1xf32>
    %19 = arith.divf %17, %18 : vector<8x1xf32>
    %20 = vector.broadcast %12 : vector<8x1xf32> to vector<8x32xf32>
    %21 = arith.subf %6, %20 : vector<8x32xf32>
    %cst_14 = arith.constant 9.99999996E-13 : f32
    %22 = vector.broadcast %cst_14 : f32 to vector<8x1xf32>
    %23 = arith.addf %19, %22 : vector<8x1xf32>
    %24 = math.rsqrt %23 : vector<8x1xf32>
    %25 = vector.broadcast %24 : vector<8x1xf32> to vector<8x32xf32>
    %26 = arith.mulf %21, %25 : vector<8x32xf32>
    %27 = vector.broadcast %7 : vector<1x32xf32> to vector<8x32xf32>
    %28 = arith.mulf %26, %27 : vector<8x32xf32>
    %29 = vector.broadcast %8 : vector<1x32xf32> to vector<8x32xf32>
    %30 = arith.addf %28, %29 : vector<8x32xf32>
    %c0_15 = arith.constant 0 : index
    %c0_16 = arith.constant 0 : index
    %c0_17 = arith.constant 0 : index
    %31 = vector.load %arg7[%c0_15, %c0_16, %c0_17] : memref<1x8x32xf32, #tpu.memory_space<vmem>>, vector<1x8x32xf32>
    %32 = vector.shape_cast %31 : vector<1x8x32xf32> to vector<8x32xf32>
    %33 = vector.shape_cast %30 : vector<8x32xf32> to vector<1x8x32xf32>
    tpu.vector_store %arg7[%c0_15, %c0_16, %c0_17], %33 {strides = array<i32>} : memref<1x8x32xf32, #tpu.memory_space<vmem>>, vector<1x8x32xf32>,
    return
  }
  func.func @transform_0(%arg0: i32, %arg1: i32) -> (i32, i32, i32) {
    %c0_i32 = arith.constant 0 : i32
    %c0_i32_0 = arith.constant 0 : i32
    return %arg0, %arg1, %c0_i32 : i32, i32, i32
  }
  func.func @transform_1(%arg0: i32, %arg1: i32) -> (i32, i32, i32) {
    %c0_i32 = arith.constant 0 : i32
    %c0_i32_0 = arith.constant 0 : i32
    return %arg0, %arg1, %c0_i32 : i32, i32, i32
  }
  func.func @transform_2(%arg0: i32, %arg1: i32) -> (i32, i32) {
    %c0_i32 = arith.constant 0 : i32
    %c0_i32_0 = arith.constant 0 : i32
    return %arg1, %c0_i32 : i32, i32
  }
  func.func @transform_3(%arg0: i32, %arg1: i32) -> (i32, i32) {
    %c0_i32 = arith.constant 0 : i32
    %c0_i32_0 = arith.constant 0 : i32
    %c0_i32_1 = arith.constant 0 : i32
    return %c0_i32, %c0_i32_0 : i32, i32
  }
  func.func @transform_4(%arg0: i32, %arg1: i32) -> (i32, i32) {
    %c0_i32 = arith.constant 0 : i32
    %c0_i32_0 = arith.constant 0 : i32
    %c0_i32_1 = arith.constant 0 : i32
    return %c0_i32, %c0_i32_0 : i32, i32
  }
  func.func @transform_5(%arg0: i32, %arg1: i32) -> (i32, i32, i32) {
    %c0_i32 = arith.constant 0 : i32
    %c0_i32_0 = arith.constant 0 : i32
    return %arg0, %arg1, %c0_i32 : i32, i32, i32
  }
}

</mosaic_0001>

<bundles_post_ra>
// kernel: tpu_custom_call.1
= control target key start
LH: loop header
LB: loop body
LE: loop exit
PB: predicated region body
PF: predicated region fallthrough
CT: control target
= control target key end

     0   :  { %s980_s0 = inlined_call_operand.hbm [shape: f32[2,8,32], index: 0, kind: input, shape index: {}]   ;;  %s981_s1 = inlined_call_operand.hbm [shape: f32[2,8,32], index: 1, kind: input, shape index: {}]   ;;  %s982_s2 = inlined_call_operand.hbm [shape: f32[8,32], index: 2, kind: input, shape index: {}]   ;;  %s983_s3 = inlined_call_operand.vmem [shape: f32[1,32], index: 3, kind: input, shape index: {}]   ;;  %s984_s4 = inlined_call_operand.vmem [shape: f32[1,32], index: 4, kind: input, shape index: {}]   ;;  %s985_s5 = inlined_call_operand.hbm [shape: f32[2,8,32], index: 5, kind: output, shape index: {}]  }
   0x1   :  { %987 = sst [smem:[#allocation14_spill]] %s980_s0 }
   0x2   :  { %988 = sst [smem:[#allocation15_spill]] %s982_s2 }
   0x3   :  { %10 = vsyncpa [#allocation3], 0 }
   0x4   :  { %12 = vsyncpa [#allocation3 + $0x1], 0 }
   0x5   :  { %13 = vsyncpa [#allocation6], 0 }
   0x6   :  { %15 = vsyncpa [#allocation6 + $0x1], 0 }
   0x7   :  { %16 = vsyncpa [#allocation4], 0 }
   0x8   :  { %18 = vsyncpa [#allocation4 + $0x1], 0  ;;  %s789_s18 = smov 0   ;;  %s791_s19 = smov 0  }
   0x9   :  { %s793_s20 = smov 0   ;;  %s795_s21 = smov 0  }
   0xa   :  { %s797_s22 = smov 0   ;;  %s799_s23 = smov 0  }
   0xb LB: > { %s820_s24 = sadd.s32 4294967295, %s753_s23   ;;  %s484_s25 = sadd.s32 4294967294, %s753_s23   ;;  %s753_s23 = sphi %s799_s23, %s24_s23   ;;  %s749_s22 = sphi %s797_s22, %s1006_s22   ;;  %s745_s21 = sphi %s795_s21, %s1005_s21   ;;  %s741_s20 = sphi %s793_s20, %s1004_s20   ;;  %s737_s19 = sphi %s791_s19, %s1003_s19   ;;  %s733_s18 = sphi %s789_s18, %s1002_s18  }
   0xc   : > { %p58_p0 = scmp.ne.s32.totalorder %s737_s19, %s733_s18  ;;  %p59_p1 = scmp.eq.s32.totalorder %s820_s24, 0 }
   0xd   : > { %p186_p3 = scmp.eq.s32.totalorder %s484_s25, 1  ;;  %p485_p5 = scmp.ge.s32.totalorder %s753_s23, 1 }
   0xe   : > { %p829_p4 = por %p59_p1, %p58_p0  ;;  %p193_p7 = scmp.lt.s32.totalorder %s753_s23, 3 }
   0xf   : > { %p834_p6 = por %p186_p3, %p58_p0  ;;  %s755_s29 = smov [#allocation7]  }
  0x10   : > { %p839_p8 = pnand %p485_p5, %p193_p7  ;;  %s208_s30 = sshll.u32 %s755_s29, 4  ;;  %s209_s30 = int_to_ptr.vmem [resolvable:$true] %s208_s30 }
  0x11   : > { %s990_s27 = scalar_select %p834_p6, 1, 0 }
  0x12   : > { %p513_p10 = pneg %p839_p8  ;;  %s36_s7 = sadd.s32 1, %s749_s22 }
  0x13   : > { %s45_s8 = sadd.s32 1, %s741_s20  ;;  %p38_p12 = scmp.ge.s32.totalorder %s36_s7, 2 }
  0x14   : > { %p848_p11 = pnand %p513_p10, %p59_p1  ;;  %s594_s9 = scalar_lea.vmem %s209_s30, 128 }
  0x15   : > { %p595_p0 = scmp.ne.s32.totalorder %s209_s30, %s594_s9  ;;  %p602_p7 = scmp.lt.s32.totalorder %s209_s30, %s209_s30 }
  0x16   : > { %p585_p13 = pneg %p848_p11  ;;  %p603_p2 = scmp.lt.s32.totalorder %s594_s9, %s594_s9 }
  0x18   : > { %p597_p3 = pnand %p595_p0, %p585_p13  ;;  %p604_p9 = por %p603_p2, %p602_p7 }
  0x1a   : > { %p598_p5 = pneg %p597_p3 }
  0x1c   : > { %p605_p6 = pnand %p604_p9, %p598_p5 }
  0x1e   : > { %608 = shalt.err (!%p605_p6)
}
  0x1f   : > { %s993_s2 = sld [smem:[#allocation15_spill]]  ;;  %s1008_s7 = smov (%p38_p12, %s36_s7), 0 }
  0x20   : > { %994 = sst [smem:[#allocation13_spill]] %s1008_s7  ;;  %p52_p2 = scmp.ne.s32.totalorder %s741_s20, %s737_s19 }
  0x21   : > { %p53_p6 = scmp.eq.s32.totalorder %s753_s23, 0  ;;  %s40_s12 = ssub.s32 %s749_s22, %s1008_s7 }
  0x22   : > { %p529_p9 = scmp.lt.s32.totalorder %s753_s23, 2  ;;  %p43_p10 = scmp.eq.s32.totalorder %s40_s12, 0 }
  0x23   : > { %p54_p13 = por %p53_p6, %p52_p2  ;;  %p995_p0 = scmp.eq.s32.totalorder %s820_s24, 1 }
  0x24   : > { %s225_s14 = sand.u32 1, %s741_s20   ;;  %s489_s17 = sshll.u32 %s749_s22, 7 }
  0x25   : > { %516 = dma.hbm_to_vmem [thread:$0]  (!%p848_p11), %s993_s2, 128, %s209_s30, [#allocation6]  }
  0x26   : > { %p871_p3 = por %p995_p0, %p52_p2  ;;  %s488_s16 = sshll.u32 %s225_s14, 3 }
  0x27   : > { %s877_s15 = scalar_select %p43_p10, %s741_s20, %s45_s8  }
  0x28   : > { %s997_s0 = sld [smem:[#allocation14_spill]]  ;;  %s229_s6 = scalar_lea.vmem [#allocation2], %s488_s16 }
  0x29   : > { %s237_s9 = sshll.u32 %s229_s6, 4  ;;  %p883_p11 = pnand %p529_p9, %p54_p13  ;;  %s238_s9 = int_to_ptr.vmem [resolvable:$true] %s237_s9 }
  0x2a   : > { %s890_s8 = scalar_lea.hbm %s981_s1, %s489_s17  ;;  %s244_s2 = sand.u32 1, %s753_s23  }
  0x2b   : > { %s226_s7 = scalar_lea.sflag [#allocation3], %s225_s14  ;;  %p611_p12 = pneg %p883_p11 }
  0x2c   : > { %s622_s25 = scalar_lea.vmem %s238_s9, 128  ;;  %s756_s29 = smov [#allocation2]  }
  0x2d   : > { %p623_p5 = scmp.ne.s32.totalorder %s238_s9, %s622_s25  ;;  %s627_s6 = sshll.u32 %s756_s29, 4  ;;  %s628_s6 = int_to_ptr.vmem [resolvable:$false] %s627_s6 }
  0x2e   : > { %s235_s30 = scalar_lea.hbm %s997_s0, %s489_s17  ;;  %s629_s0 = scalar_lea.vmem %s628_s6, 256 }
  0x2f   : > { %p625_p7 = pnand %p623_p5, %p611_p12  ;;  %p630_p6 = scmp.lt.s32.totalorder %s238_s9, %s628_s6 }
  0x30   : > { %p631_p9 = scmp.lt.s32.totalorder %s629_s0, %s622_s25 }
  0x31   : > { %p626_p2 = pneg %p625_p7 }
  0x32   : > { %p632_p10 = por %p631_p9, %p630_p6 }
  0x34   : > { %p633_p13 = pnand %p632_p10, %p626_p2 }
  0x36   : > { %636 = shalt.err (!%p633_p13)
}
  0x37   : > { %520 = dma.hbm_to_vmem [thread:$0]  (!%p883_p11), %s235_s30, 128, %s238_s9, %s226_s7  }
  0x38   : > { %s248_s14 = scalar_lea.vmem [#allocation5], %s488_s16  ;;  %s245_s11 = scalar_lea.sflag [#allocation6], %s244_s2 }
  0x39   : > { %s256_s17 = sshll.u32 %s248_s14, 4  ;;  %s757_s29 = smov [#allocation5]   ;;  %s257_s17 = int_to_ptr.vmem [resolvable:$true] %s256_s17 }
  0x3a   : > { %s650_s12 = scalar_lea.vmem %s257_s17, 128  ;;  %s655_s6 = sshll.u32 %s757_s29, 4  ;;  %s656_s6 = int_to_ptr.vmem [resolvable:$false] %s655_s6 }
  0x3b   : > { %p651_p0 = scmp.ne.s32.totalorder %s257_s17, %s650_s12  ;;  %s657_s0 = scalar_lea.vmem %s656_s6, 256 }
  0x3c   : > { %p658_p2 = scmp.lt.s32.totalorder %s257_s17, %s656_s6  ;;  %p659_p6 = scmp.lt.s32.totalorder %s657_s0, %s650_s12 }
  0x3d   : > { %p653_p5 = pnand %p651_p0, %p611_p12 }
  0x3e   : > { %p660_p9 = por %p659_p6, %p658_p2 }
  0x3f   : > { %p654_p7 = pneg %p653_p5 }
  0x41   : > { %p661_p10 = pnand %p660_p9, %p654_p7 }
  0x43   : > { %664 = shalt.err (!%p661_p10)
}
  0x44   : > { %523 = dma.hbm_to_vmem [thread:$0]  (!%p883_p11), %s890_s8, 128, %s257_s17, %s245_s11  }
  0x45   : > { %265 = sbr.rel (%p839_p8) target bundleno = 406 (0x196), region = 40  ;;  %s909_s2 = sand.u32 (!%p839_p8), 1, %s737_s19  }
  0x46   : > { %s912_s7 = sshll.u32 (!%p839_p8), %s909_s2, 3  ;;  %s268_s16 = scalar_lea.sflag (!%p839_p8), [#allocation3], %s909_s2 }
  0x47   : > { %s271_s30 = scalar_lea.vmem (!%p839_p8), [#allocation2], %s912_s7 }
  0x4a   : > { %716 = dma.done.wait (%p829_p4), %s268_s16, 128  }
  0x4b   : > { %718 = vsyncadd (%p829_p4), %s268_s16, 4294967168  ;;  %s276_s28 = sand.u32 1, %s820_s24   ;;  %s280_s10 = scalar_lea.vmem [#allocation5], %s912_s7 }
  0x4c   : > { %s277_s9 = scalar_lea.sflag [#allocation6], %s276_s28 }
  0x4d   : > { %720 = dma.done.wait (%p829_p4), %s277_s9, 128  }
  0x4e   : > { %722 = vsyncadd (%p829_p4), %s277_s9, 4294967168 }
  0x4f   : > { %724 = dma.done.wait (%p59_p1), [#allocation6], 128  }
  0x50   : > { %726 = vsyncadd (%p59_p1), [#allocation6], 4294967168  ;;  %v316_v0 = vld [vmem:[%s271_s30] sm:$0xff]  ;;  %v317_v1 = vld [vmem:[%s280_s10] sm:$0xff]  ;;  %vm323_vm0 = vcmask 261120   ;;  %s500_s14 = sshll.u32 %s745_s21, 7 }
  0x51   : > { %v319_v2 = vld [vmem:[#allocation7] sm:$0xff]  ;;  %v318_v3 = vadd.f32 %v317_v1, %v316_v0  ;;  %s315_s17 = scalar_lea.vmem [#allocation8], %s912_s7  ;;  %s366_s6 = scalar_lea.hbm %s985_s5, %s500_s14 }
  0x52   : > { %v497_v15 = vld [vmem:[%s983_s3] ss:$0 sm:$0xff]  ;;  %s368_s11 = sshll.u32 %s315_s17, 4  ;;  %s354_s0 = scalar_lea.sflag [#allocation4], %s909_s2  ;;  %s369_s11 = int_to_ptr.vmem [resolvable:$true] %s368_s11 }
  0x53   : > { %v320_v4 = vadd.f32 %v319_v2, %v318_v3  ;;  %v498_v17 = vld [vmem:[%s984_s4] ss:$0 sm:$0xff]  ;;  %s665_s16 = scalar_lea.vmem %s369_s11, 128  ;;  %s758_s30 = smov [#allocation8]  }
  0x54   : > { %p666_p1 = scmp.ne.s32.totalorder %s369_s11, %s665_s16  ;;  %s669_s28 = sshll.u32 %s758_s30, 4  ;;  %s670_s28 = int_to_ptr.vmem [resolvable:$false] %s669_s28 }
  0x55   : > { %v324_v5 = vsel %vm323_vm0, %v320_v4, 0.0  ;;  %s671_s21 = scalar_lea.vmem %s670_s28, 256  ;;  %p672_p11 = scmp.lt.s32.totalorder %s369_s11, %s670_s28 }
  0x56   : > { %325 = vadd.xlane.f32.xlu0 %v324_v5  ;;  %p667_p4 = pnand %p666_p1, %p871_p3  ;;  %p673_p12 = scmp.lt.s32.totalorder %s671_s21, %s665_s16 }
  0x58   : > { %p668_p8 = pneg %p667_p4  ;;  %p674_p13 = por %p673_p12, %p672_p11 }
  0x5a   : > { %p675_p0 = pnand %p674_p13, %p668_p8 }
  0xdf   : > { %v326_v6 = vpop.xlane.xlu0 %325 }
  0xe0   : > { %v328_v7 = vmul.f32 0.03125, %v326_v6 }
  0xe2   : > { %v329_v8 = vsub.f32 %v320_v4, %v328_v7 }
  0xe4   : > { %v330_v9 = vmul.f32 %v329_v8, %v329_v8 }
  0xe6   : > { %v331_v10 = vsel %vm323_vm0, %v330_v9, 0.0 }
  0xe7   : > { %332 = vadd.xlane.f32.xlu0 %v331_v10 }
 0x170   : > { %v333_v11 = vpop.xlane.xlu0 %332 }
 0x171   : > { %v334_v12 = vmul.f32 0.03125, %v333_v11 }
 0x173   : > { %v335_v13 = vadd.f32 1e-12, %v334_v12 }
 0x175   : > { %581 = vrsqrt.f32 %v335_v13 }
 0x182   : > { %v582_v14 = vpop.eup %581 }
 0x183   : > { %v337_v16 = vmul.f32 %v582_v14, %v329_v8 }
 0x185   : > { %v344_v18 = vmul.f32 %v497_v15, %v337_v16 }
 0x187   : > { %v351_v19 = vadd.f32 %v498_v17, %v344_v18 }
 0x189   : > { %352 = vst.msk [vmem:[%s315_s17] sm:$0xff] %vm323_vm0, %v351_v19 }
 0x18a   : > { %678 = shalt.err (!%p675_p0)
}
 0x18b   : > { %s679_s7 = scalar_lea.hbm %s366_s6, 128  ;;  %s683_s10 = scalar_lea.hbm %s985_s5, 256 }
 0x18c   : > { %p680_p5 = scmp.ne.s32.totalorder %s366_s6, %s679_s7  ;;  %p684_p6 = scmp.lt.s32.totalorder %s366_s6, %s985_s5 }
 0x18d   : > { %p685_p9 = scmp.lt.s32.totalorder %s683_s10, %s679_s7 }
 0x18e   : > { %p681_p7 = pnand %p680_p5, %p871_p3 }
 0x18f   : > { %p686_p10 = por %p685_p9, %p684_p6 }
 0x190   : > { %p682_p2 = pneg %p681_p7 }
 0x192   : > { %p687_p1 = pnand %p686_p10, %p682_p2 }
 0x194   : > { %690 = shalt.err (!%p687_p1)
}
 0x195   : > { %511 = dma.vmem_to_hbm [thread:$0]  (%p871_p3), %s369_s11, 128, %s366_s6, %s354_s0  }
 0x196 PF: > { %s380_s8 = sand.u32 1, %s733_s18   ;;  %p999_p4 = scmp.ne.s32.totalorder %s990_s27, 0 }
 0x197   : > { %p1000_p8 = scmp.ge.s32.totalorder %s753_s23, 2  ;;  %s381_s25 = scalar_lea.sflag [#allocation4], %s380_s8 }
 0x199   : > { %p525_p11 = pnand %p1000_p8, %p999_p4 }
 0x19b   : > { %p526_p12 = pneg %p525_p11 }
 0x19d   : > { %728 = dma.done.wait (%p526_p12), %s381_s25, 128  }
 0x19e   : > { %730 = vsyncadd (%p526_p12), %s381_s25, 4294967168  ;;  %s24_s23 = sadd.s32 1, %s753_s23   ;;  %s1001_s13 = sld [smem:[#allocation13_spill]] }
 0x19f   : > { %p21_p13 = scmp.ge.s32.totalorder %s24_s23, 4   ;;  %s1002_s18 = smov %s737_s19 }
 0x1a0   : > { %s1003_s19 = smov %s741_s20  ;;  %s1004_s20 = smov %s877_s15 }
 0x1a1   : > { %s1005_s21 = smov %s749_s22  ;;  %23 = sbr.rel (!%p21_p13) target bundleno = 11 (0xb), region = 103 }
 0x1a4   : > { %s1006_s22 = smov %s1001_s13 }
 0x1a6   :  { %386 = vsyncpa [#allocation3], 1 }
 0x1a7   :  { %388 = vsyncpa [#allocation3 + $0x1], 1 }
 0x1a8   :  { %389 = vsyncpa [#allocation6], 1 }
 0x1a9   :  { %391 = vsyncpa [#allocation6 + $0x1], 1 }
 0x1aa   :  { %392 = vsyncpa [#allocation4], 1 }
 0x1ab   :  { %394 = vsyncpa [#allocation4 + $0x1], 1 }

</bundles_post_ra>
